<compile_context>
chip_gen: v5e
topology: v5e:2x2
jax: 0.10.0
libtpu: 0.0.40
codegen_flags: <defaults>
</compile_context>

<pallas_src>
import functools
import math

import jax
import jax.numpy as jnp
from jax.experimental import pallas as pl
from jax.experimental.pallas import tpu as pltpu

EPS = 1e-6


def _encoder_layer_kernel(
    xbf_ref,                  # (1, L, D)             bf16  full sequence (per batch elem)
    xres_ref,                 # (1, TQ, D)            f32   residual tile
    wq_ref,                   # (D, H*dk)             bf16  (1/sqrt(dk) pre-folded)
    wkv_ref,                  # (D, H*dk + H*dv)      bf16  (wk | wv fused)
    wo_ref,                   # (H*dv, D)             bf16
    ln1_g_ref, ln1_b_ref,     # (1, D)                f32
    w1_ref, b1_ref,           # (D, d_inner) bf16, (1, d_inner) f32
    w2_ref, b2_ref,           # (d_inner, D) bf16, (1, D) f32
    ln2_g_ref, ln2_b_ref,     # (1, D)                f32
    out_ref,                  # (1, TQ, D)            f32
    attn_ref,                 # (1, H, TQ, L)         bf16
    k_sc, v_sc,               # VMEM (H, L, dk)/(H, L, dv)  bf16   per-batch K/V cache
    q_sc,                     # VMEM (H, TQ, dk)            bf16   per-tile Q staging
    ctx_sc,                   # VMEM (TQ, H*dv)             bf16   lane-concat context
    *, n_head, d_k, d_v, tq,
):
    qi = pl.program_id(1)
    hdk = n_head * d_k

    # ---- fused K/V projection for the whole sequence, once per batch element ----
    # Inputs with constant block index along qi are not re-DMA'd; only this compute
    # is gated.  Scratch persists across the qi axis (which must stay "arbitrary").
    @pl.when(qi == 0)
    def _():
        kv = jnp.dot(xbf_ref[0], wkv_ref[...],
                     preferred_element_type=jnp.float32).astype(jnp.bfloat16)
        for h in range(n_head):                       # head-major cache (2 slices/head)
            k_sc[h] = kv[:, h * d_k:(h + 1) * d_k]
            v_sc[h] = kv[:, hdk + h * d_v: hdk + (h + 1) * d_v]

    row0 = pl.multiple_of(qi * tq, tq)
    x_tile_bf = xbf_ref[0, pl.ds(row0, tq), :]        # (TQ, D) bf16, for projections
    x_res = xres_ref[0]                               # (TQ, D) f32, exact residual

    # ---- per-tile Q projection (scale already folded into wq) ----
    q_all = jnp.dot(x_tile_bf, wq_ref[...],
                    preferred_element_type=jnp.float32).astype(jnp.bfloat16)
    for h in range(n_head):                           # head-major staging for batching
        q_sc[h] = q_all[:, h * d_k:(h + 1) * d_k]

    qh = q_sc[...]                                    # (H, TQ, dk) bf16
    kh = k_sc[...]                                    # (H, L,  dk) bf16
    vh = v_sc[...]                                    # (H, L,  dv) bf16

    # ---- scaled dot-product attention, heads batched (transpose folded into MXU) ----
    s = jnp.einsum("hqd,hkd->hqk", qh, kh,
                   preferred_element_type=jnp.float32)          # (H, TQ, L) f32
    s_max = jnp.max(s, axis=-1, keepdims=True)
    p = jnp.exp(s - s_max)
    # approx reciprocal error (~2^-12) << bf16 storage rounding of the attn output.
    p = p * pl.reciprocal(jnp.sum(p, axis=-1, keepdims=True), approx=True)
    p_bf = p.astype(jnp.bfloat16)
    attn_ref[0] = p_bf                                           # single bf16 slab store

    ctx = jnp.einsum("hqk,hkd->hqd", p_bf, vh,
                     preferred_element_type=jnp.float32)         # (H, TQ, dv) f32
    for h in range(n_head):                                      # lane-concat contexts
        ctx_sc[:, h * d_v:(h + 1) * d_v] = ctx[h].astype(jnp.bfloat16)

    # Output projection: one deep matmul over K = H*dv, then the f32 residual.
    o = jnp.dot(ctx_sc[...], wo_ref[...],
                preferred_element_type=jnp.float32) + x_res      # (TQ, D) f32

    # ---- LayerNorm 1 (f32, eps=1e-6) ----
    mu = jnp.mean(o, axis=-1, keepdims=True)
    var = jnp.mean((o - mu) ** 2, axis=-1, keepdims=True)
    a = (o - mu) * jax.lax.rsqrt(var + EPS) * ln1_g_ref[...] + ln1_b_ref[...]

    # ---- position-wise feed-forward: w2(relu(w1(x))) + residual + LayerNorm 2 ----
    h1 = jnp.dot(a.astype(jnp.bfloat16), w1_ref[...],
                 preferred_element_type=jnp.float32) + b1_ref[...]
    h1 = jnp.maximum(h1, 0.0)
    f = jnp.dot(h1.astype(jnp.bfloat16), w2_ref[...],
                preferred_element_type=jnp.float32) + b2_ref[...] + a
    mu2 = jnp.mean(f, axis=-1, keepdims=True)
    var2 = jnp.mean((f - mu2) ** 2, axis=-1, keepdims=True)
    out_ref[0] = (f - mu2) * jax.lax.rsqrt(var2 + EPS) * ln2_g_ref[...] + ln2_b_ref[...]


def _vmem_budget_bytes(L, D, d_inner, n_head, d_k, d_v, tq):
    """Estimate per-step VMEM: default double-buffered pipeline blocks + scratch."""
    bf, f32 = 2, 4
    dbl = 2
    blocks = dbl * (
        L * D * bf                                   # x bf16 (resident per batch elem)
        + tq * D * f32                               # residual tile
        + D * n_head * d_k * bf                      # wq
        + D * (n_head * d_k + n_head * d_v) * bf     # wkv
        + n_head * d_v * D * bf                      # wo
        + D * d_inner * bf + d_inner * f32           # w1, b1
        + d_inner * D * bf + D * f32                 # w2, b2
        + 4 * D * f32                                # ln1/ln2 gamma+beta
        + tq * D * f32                               # out tile
        + n_head * tq * L * bf                       # attn tile (bf16)
    )
    scratch = bf * (n_head * L * d_k + n_head * L * d_v
                    + n_head * tq * d_k + tq * n_head * d_v)
    return blocks + scratch


def encoder_layer(x, params, *, n_head, d_k, d_v, tq=None):
    """x: (B, L, D) float32.  Returns (encoder_output (B,L,D) f32, attn (B,H,L,L) bf16)."""
    B, L, D = x.shape
    d_inner = params["w1"].shape[1]
    if tq is None:
        # v6e can afford tq=256 for long L once weights are single-buffered;
        # v7x (64 MiB VMEM) should drop to 64 for very long sequences.
        tq = L if L <= 128 else 128
    assert L % tq == 0, "sequence length must be divisible by the query-tile size"
    n_qt = L // tq

    # Fold 1/sqrt(d_k) into wq (in f32, before the bf16 cast — exact enough for any d_k).
    wq = (params["wq"] * (1.0 / math.sqrt(d_k))).astype(jnp.bfloat16)
    # Fused K|V projection weights; all MXU weights pre-cast to bf16.
    wkv = jnp.concatenate([params["wk"], params["wv"]], axis=1).astype(jnp.bfloat16)
    wo = params["wo"].astype(jnp.bfloat16)                        # (H*dv, D), kept flat
    w1 = params["w1"].astype(jnp.bfloat16)
    w2 = params["w2"].astype(jnp.bfloat16)
    x_bf = x.astype(jnp.bfloat16)                                 # projections input

    est = _vmem_budget_bytes(L, D, d_inner, n_head, d_k, d_v, tq)
    # 25% headroom for compiler temporaries; floor at the scoped default.
    vmem_limit = int(min(max(32 * 1024 * 1024, 1.25 * est), 100 * 1024 * 1024))

    const = lambda shape: pl.BlockSpec(shape, lambda b, qi: (0,) * len(shape))

    kernel = functools.partial(
        _encoder_layer_kernel, n_head=n_head, d_k=d_k, d_v=d_v, tq=tq)

    return pl.pallas_call(
        kernel,
        out_shape=(
            jax.ShapeDtypeStruct((B, L, D), jnp.float32),
            jax.ShapeDtypeStruct((B, n_head, L, L), jnp.bfloat16),
        ),
        grid_spec=pltpu.PrefetchScalarGridSpec(
            num_scalar_prefetch=0,
            grid=(B, n_qt),
            in_specs=[
                pl.BlockSpec((1, L, D), lambda b, qi: (b, 0, 0)),    # x bf16, per-b resident
                pl.BlockSpec((1, tq, D), lambda b, qi: (b, qi, 0)),  # x f32 residual tile
                const((D, n_head * d_k)),                            # wq (scale folded)
                const((D, n_head * d_k + n_head * d_v)),             # wkv
                const((n_head * d_v, D)),                            # wo
                const((1, D)), const((1, D)),                        # ln1 gamma/beta
                const((D, d_inner)), const((1, d_inner)),            # w1, b1
                const((d_inner, D)), const((1, D)),                  # w2, b2
                const((1, D)), const((1, D)),                        # ln2 gamma/beta
            ],
            out_specs=[
                pl.BlockSpec((1, tq, D), lambda b, qi: (b, qi, 0)),
                pl.BlockSpec((1, n_head, tq, L), lambda b, qi: (b, 0, qi, 0)),
            ],
            scratch_shapes=[
                pltpu.VMEM((n_head, L, d_k), jnp.bfloat16),     # K cache (head-major)
                pltpu.VMEM((n_head, L, d_v), jnp.bfloat16),     # V cache
                pltpu.VMEM((n_head, tq, d_k), jnp.bfloat16),    # per-tile Q staging
                pltpu.VMEM((tq, n_head * d_v), jnp.bfloat16),   # lane-concat context
            ],
        ),
        compiler_params=pltpu.CompilerParams(
            # qi must stay sequential ("arbitrary"): the K/V cache written at qi == 0
            # is reused by later query tiles of the same batch element.
            dimension_semantics=("parallel", "arbitrary"),
            vmem_limit_bytes=vmem_limit,
        ),
    )(
        x_bf, x,
        wq, wkv, wo,
        params["ln1_g"], params["ln1_b"],
        w1, params["b1"], w2, params["b2"],
        params["ln2_g"], params["ln2_b"],
    )


def _reference(x, p, *, n_head, d_k, d_v):
    """Pure-JAX f32 reference of the same forward (for verification)."""
    B, L, D = x.shape
    q = (x @ p["wq"]).reshape(B, L, n_head, d_k).transpose(0, 2, 1, 3)
    k = (x @ p["wk"]).reshape(B, L, n_head, d_k).transpose(0, 2, 1, 3)
    v = (x @ p["wv"]).reshape(B, L, n_head, d_v).transpose(0, 2, 1, 3)
    s = jnp.einsum("bhld,bhmd->bhlm", q, k) / math.sqrt(d_k)
    attn = jax.nn.softmax(s, axis=-1)
    ctx = jnp.einsum("bhlm,bhmd->bhld", attn, v).transpose(0, 2, 1, 3).reshape(B, L, -1)
    o = ctx @ p["wo"] + x
    mu = o.mean(-1, keepdims=True); var = ((o - mu) ** 2).mean(-1, keepdims=True)
    a = (o - mu) / jnp.sqrt(var + EPS) * p["ln1_g"][0] + p["ln1_b"][0]
    h = jax.nn.relu(a @ p["w1"] + p["b1"][0])
    f = h @ p["w2"] + p["b2"][0] + a
    mu2 = f.mean(-1, keepdims=True); var2 = ((f - mu2) ** 2).mean(-1, keepdims=True)
    out = (f - mu2) / jnp.sqrt(var2 + EPS) * p["ln2_g"][0] + p["ln2_b"][0]
    return out, attn


def init_params(key, d_model, d_inner, n_head, d_k, d_v):
    ks = jax.random.split(key, 6)
    scale = 0.1
    return {
        "wq": scale * jax.random.normal(ks[0], (d_model, n_head * d_k), jnp.float32),
        "wk": scale * jax.random.normal(ks[1], (d_model, n_head * d_k), jnp.float32),
        "wv": scale * jax.random.normal(ks[2], (d_model, n_head * d_v), jnp.float32),
        "wo": scale * jax.random.normal(ks[3], (n_head * d_v, d_model), jnp.float32),
        "ln1_g": jnp.ones((1, d_model), jnp.float32),
        "ln1_b": jnp.zeros((1, d_model), jnp.float32),
        "w1": scale * jax.random.normal(ks[4], (d_model, d_inner), jnp.float32),
        "b1": jnp.zeros((1, d_inner), jnp.float32),
        "w2": scale * jax.random.normal(ks[5], (d_inner, d_model), jnp.float32),
        "b2": jnp.zeros((1, d_model), jnp.float32),
        "ln2_g": jnp.ones((1, d_model), jnp.float32),
        "ln2_b": jnp.zeros((1, d_model), jnp.float32),
    }


if __name__ == "__main__":
    B, L = 2, 8
    d_model, d_inner, n_head, d_k, d_v = 32, 64, 4, 8, 8

    key = jax.random.PRNGKey(0)
    kx, kp = jax.random.split(key)
    x = jax.random.normal(kx, (B, L, d_model), jnp.float32)
    params = init_params(kp, d_model, d_inner, n_head, d_k, d_v)

    out, attn = encoder_layer(x, params, n_head=n_head, d_k=d_k, d_v=d_v)
    out = jax.block_until_ready(out)
    attn = jax.block_until_ready(attn)

    ref_out, ref_attn = _reference(x, params, n_head=n_head, d_k=d_k, d_v=d_v)
    assert out.shape == (B, L, d_model) and attn.shape == (B, n_head, L, L)
    assert attn.dtype == jnp.bfloat16

    attn_f32 = attn.astype(jnp.float32)
    # Kernel uses bf16 MXU inputs (f32 accumulation) and stores attn as bf16, so
    # tolerances are looser than a pure-f32 comparison would allow.
    assert jnp.allclose(out, ref_out, atol=1e-1, rtol=5e-2), \
        float(jnp.max(jnp.abs(out - ref_out)))
    assert jnp.allclose(attn_f32, ref_attn, atol=2e-2, rtol=5e-2), \
        float(jnp.max(jnp.abs(attn_f32 - ref_attn)))
    # Attention rows must still be a valid distribution (within bf16 rounding).
    assert jnp.allclose(attn_f32.sum(-1), 1.0, atol=2e-2)

    print("KERNEL_OK")
</pallas_src>

<mosaic_0001>
module attributes {stable_mosaic.version = 11 : i64} {
  func.func @_encoder_layer_kernel(%arg0: i32, %arg1: i32, %arg2: memref<1x8x32xbf16, #tpu.memory_space<vmem>>, %arg3: memref<1x8x32xf32, #tpu.memory_space<vmem>>, %arg4: memref<32x32xbf16, #tpu.memory_space<vmem>>, %arg5: memref<32x64xbf16, #tpu.memory_space<vmem>>, %arg6: memref<32x32xbf16, #tpu.memory_space<vmem>>, %arg7: memref<1x32xf32, #tpu.memory_space<vmem>>, %arg8: memref<1x32xf32, #tpu.memory_space<vmem>>, %arg9: memref<32x64xbf16, #tpu.memory_space<vmem>>, %arg10: memref<1x64xf32, #tpu.memory_space<vmem>>, %arg11: memref<64x32xbf16, #tpu.memory_space<vmem>>, %arg12: memref<1x32xf32, #tpu.memory_space<vmem>>, %arg13: memref<1x32xf32, #tpu.memory_space<vmem>>, %arg14: memref<1x32xf32, #tpu.memory_space<vmem>>, %arg15: memref<1x8x32xf32, #tpu.memory_space<vmem>>, %arg16: memref<1x4x8x8xbf16, #tpu.memory_space<vmem>>, %arg17: memref<4x8x8xbf16, #tpu.memory_space<vmem>>, %arg18: memref<4x8x8xbf16, #tpu.memory_space<vmem>>, %arg19: memref<4x8x8xbf16, #tpu.memory_space<vmem>>, %arg20: memref<8x32xbf16, #tpu.memory_space<vmem>>) attributes {dimension_semantics = [#tpu.dimension_semantics<parallel>, #tpu.dimension_semantics<arbitrary>], iteration_bounds = array<i64: 2, 1>, scalar_prefetch = 0 : i64, scratch_operands = 4 : i64, tpu.core_type = #tpu.core_type<tc>, window_params = [{transform_indices = @transform_0, window_bounds = array<i64: 1, 8, 32>}, {transform_indices = @transform_1, window_bounds = array<i64: 1, 8, 32>}, {pipeline_mode = #tpu.pipeline_mode<synchronous>, transform_indices = @transform_2, window_bounds = array<i64: 32, 32>}, {pipeline_mode = #tpu.pipeline_mode<synchronous>, transform_indices = @transform_3, window_bounds = array<i64: 32, 64>}, {pipeline_mode = #tpu.pipeline_mode<synchronous>, transform_indices = @transform_4, window_bounds = array<i64: 32, 32>}, {pipeline_mode = #tpu.pipeline_mode<synchronous>, transform_indices = @transform_5, window_bounds = array<i64: 1, 32>}, {pipeline_mode = #tpu.pipeline_mode<synchronous>, transform_indices = @transform_6, window_bounds = array<i64: 1, 32>}, {pipeline_mode = #tpu.pipeline_mode<synchronous>, transform_indices = @transform_7, window_bounds = array<i64: 32, 64>}, {pipeline_mode = #tpu.pipeline_mode<synchronous>, transform_indices = @transform_8, window_bounds = array<i64: 1, 64>}, {pipeline_mode = #tpu.pipeline_mode<synchronous>, transform_indices = @transform_9, window_bounds = array<i64: 64, 32>}, {pipeline_mode = #tpu.pipeline_mode<synchronous>, transform_indices = @transform_10, window_bounds = array<i64: 1, 32>}, {pipeline_mode = #tpu.pipeline_mode<synchronous>, transform_indices = @transform_11, window_bounds = array<i64: 1, 32>}, {pipeline_mode = #tpu.pipeline_mode<synchronous>, transform_indices = @transform_12, window_bounds = array<i64: 1, 32>}, {transform_indices = @transform_13, window_bounds = array<i64: 1, 8, 32>}, {transform_indices = @transform_14, window_bounds = array<i64: 1, 4, 8, 8>}]} {
    %c0_i32 = arith.constant 0 : i32
    %0 = arith.cmpi eq, %arg1, %c0_i32 : i32
    %1 = arith.extui %0 : i1 to i32
    %c0_i32_0 = arith.constant 0 : i32
    %2 = arith.cmpi ne, %1, %c0_i32_0 : i32
    scf.if %2 {
      %c0_75 = arith.constant 0 : index
      %c0_76 = arith.constant 0 : index
      %c0_77 = arith.constant 0 : index
      %134 = vector.load %arg2[%c0_75, %c0_76, %c0_77] : memref<1x8x32xbf16, #tpu.memory_space<vmem>>, vector<1x8x32xbf16>
      %135 = vector.shape_cast %134 : vector<1x8x32xbf16> to vector<8x32xbf16>
      %c0_78 = arith.constant 0 : index
      %c0_79 = arith.constant 0 : index
      %136 = vector.load %arg5[%c0_78, %c0_79] : memref<32x64xbf16, #tpu.memory_space<vmem>>, vector<32x64xbf16>
      %cst_80 = arith.constant dense<0.000000e+00> : vector<8x64xf32>
      %137 = tpu.matmul %135, %136, %cst_80 {dimension_numbers = #tpu.dot_dimension_numbers<[1], [0], [0], [1], [0, 0, 1, 1], [], []>} : vector<8x32xbf16>, vector<32x64xbf16>, vector<8x64xf32> -> vector<8x64xf32>
      %138 = arith.truncf %137 : vector<8x64xf32> to vector<8x64xbf16>
      %139 = vector.extract_strided_slice %138 {offsets = [0, 0], sizes = [8, 8], strides = [1, 1]} : vector<8x64xbf16> to vector<8x8xbf16>
      %c0_81 = arith.constant 0 : index
      %c0_82 = arith.constant 0 : index
      %c0_83 = arith.constant 0 : index
      %140 = vector.load %arg17[%c0_81, %c0_82, %c0_83] : memref<4x8x8xbf16, #tpu.memory_space<vmem>>, vector<1x8x8xbf16>
      %141 = vector.shape_cast %140 : vector<1x8x8xbf16> to vector<8x8xbf16>
      %142 = vector.shape_cast %139 : vector<8x8xbf16> to vector<1x8x8xbf16>
      tpu.vector_store %arg17[%c0_81, %c0_82, %c0_83], %142 {strides = array<i32>} : memref<4x8x8xbf16, #tpu.memory_space<vmem>>, vector<1x8x8xbf16>,
      %143 = vector.extract_strided_slice %138 {offsets = [0, 32], sizes = [8, 8], strides = [1, 1]} : vector<8x64xbf16> to vector<8x8xbf16>
      %c0_84 = arith.constant 0 : index
      %c0_85 = arith.constant 0 : index
      %c0_86 = arith.constant 0 : index
      %144 = vector.load %arg18[%c0_84, %c0_85, %c0_86] : memref<4x8x8xbf16, #tpu.memory_space<vmem>>, vector<1x8x8xbf16>
      %145 = vector.shape_cast %144 : vector<1x8x8xbf16> to vector<8x8xbf16>
      %146 = vector.shape_cast %143 : vector<8x8xbf16> to vector<1x8x8xbf16>
      tpu.vector_store %arg18[%c0_84, %c0_85, %c0_86], %146 {strides = array<i32>} : memref<4x8x8xbf16, #tpu.memory_space<vmem>>, vector<1x8x8xbf16>,
      %147 = vector.extract_strided_slice %138 {offsets = [0, 8], sizes = [8, 8], strides = [1, 1]} : vector<8x64xbf16> to vector<8x8xbf16>
      %c1_87 = arith.constant 1 : index
      %c0_88 = arith.constant 0 : index
      %c0_89 = arith.constant 0 : index
      %148 = vector.load %arg17[%c1_87, %c0_88, %c0_89] : memref<4x8x8xbf16, #tpu.memory_space<vmem>>, vector<1x8x8xbf16>
      %149 = vector.shape_cast %148 : vector<1x8x8xbf16> to vector<8x8xbf16>
      %150 = vector.shape_cast %147 : vector<8x8xbf16> to vector<1x8x8xbf16>
      tpu.vector_store %arg17[%c1_87, %c0_88, %c0_89], %150 {strides = array<i32>} : memref<4x8x8xbf16, #tpu.memory_space<vmem>>, vector<1x8x8xbf16>,
      %151 = vector.extract_strided_slice %138 {offsets = [0, 40], sizes = [8, 8], strides = [1, 1]} : vector<8x64xbf16> to vector<8x8xbf16>
      %c1_90 = arith.constant 1 : index
      %c0_91 = arith.constant 0 : index
      %c0_92 = arith.constant 0 : index
      %152 = vector.load %arg18[%c1_90, %c0_91, %c0_92] : memref<4x8x8xbf16, #tpu.memory_space<vmem>>, vector<1x8x8xbf16>
      %153 = vector.shape_cast %152 : vector<1x8x8xbf16> to vector<8x8xbf16>
      %154 = vector.shape_cast %151 : vector<8x8xbf16> to vector<1x8x8xbf16>
      tpu.vector_store %arg18[%c1_90, %c0_91, %c0_92], %154 {strides = array<i32>} : memref<4x8x8xbf16, #tpu.memory_space<vmem>>, vector<1x8x8xbf16>,
      %155 = vector.extract_strided_slice %138 {offsets = [0, 16], sizes = [8, 8], strides = [1, 1]} : vector<8x64xbf16> to vector<8x8xbf16>
      %c2_93 = arith.constant 2 : index
      %c0_94 = arith.constant 0 : index
      %c0_95 = arith.constant 0 : index
      %156 = vector.load %arg17[%c2_93, %c0_94, %c0_95] : memref<4x8x8xbf16, #tpu.memory_space<vmem>>, vector<1x8x8xbf16>
      %157 = vector.shape_cast %156 : vector<1x8x8xbf16> to vector<8x8xbf16>
      %158 = vector.shape_cast %155 : vector<8x8xbf16> to vector<1x8x8xbf16>
      tpu.vector_store %arg17[%c2_93, %c0_94, %c0_95], %158 {strides = array<i32>} : memref<4x8x8xbf16, #tpu.memory_space<vmem>>, vector<1x8x8xbf16>,
      %159 = vector.extract_strided_slice %138 {offsets = [0, 48], sizes = [8, 8], strides = [1, 1]} : vector<8x64xbf16> to vector<8x8xbf16>
      %c2_96 = arith.constant 2 : index
      %c0_97 = arith.constant 0 : index
      %c0_98 = arith.constant 0 : index
      %160 = vector.load %arg18[%c2_96, %c0_97, %c0_98] : memref<4x8x8xbf16, #tpu.memory_space<vmem>>, vector<1x8x8xbf16>
      %161 = vector.shape_cast %160 : vector<1x8x8xbf16> to vector<8x8xbf16>
      %162 = vector.shape_cast %159 : vector<8x8xbf16> to vector<1x8x8xbf16>
      tpu.vector_store %arg18[%c2_96, %c0_97, %c0_98], %162 {strides = array<i32>} : memref<4x8x8xbf16, #tpu.memory_space<vmem>>, vector<1x8x8xbf16>,
      %163 = vector.extract_strided_slice %138 {offsets = [0, 24], sizes = [8, 8], strides = [1, 1]} : vector<8x64xbf16> to vector<8x8xbf16>
      %c3_99 = arith.constant 3 : index
      %c0_100 = arith.constant 0 : index
      %c0_101 = arith.constant 0 : index
      %164 = vector.load %arg17[%c3_99, %c0_100, %c0_101] : memref<4x8x8xbf16, #tpu.memory_space<vmem>>, vector<1x8x8xbf16>
      %165 = vector.shape_cast %164 : vector<1x8x8xbf16> to vector<8x8xbf16>
      %166 = vector.shape_cast %163 : vector<8x8xbf16> to vector<1x8x8xbf16>
      tpu.vector_store %arg17[%c3_99, %c0_100, %c0_101], %166 {strides = array<i32>} : memref<4x8x8xbf16, #tpu.memory_space<vmem>>, vector<1x8x8xbf16>,
      %167 = vector.extract_strided_slice %138 {offsets = [0, 56], sizes = [8, 8], strides = [1, 1]} : vector<8x64xbf16> to vector<8x8xbf16>
      %c3_102 = arith.constant 3 : index
      %c0_103 = arith.constant 0 : index
      %c0_104 = arith.constant 0 : index
      %168 = vector.load %arg18[%c3_102, %c0_103, %c0_104] : memref<4x8x8xbf16, #tpu.memory_space<vmem>>, vector<1x8x8xbf16>
      %169 = vector.shape_cast %168 : vector<1x8x8xbf16> to vector<8x8xbf16>
      %170 = vector.shape_cast %167 : vector<8x8xbf16> to vector<1x8x8xbf16>
      tpu.vector_store %arg18[%c3_102, %c0_103, %c0_104], %170 {strides = array<i32>} : memref<4x8x8xbf16, #tpu.memory_space<vmem>>, vector<1x8x8xbf16>,
    } else {
    }
    %c8_i32 = arith.constant 8 : i32
    %3 = arith.muli %arg1, %c8_i32 : i32
    %4 = tpu.assume_multiple %3, 8 : i32
    %c0 = arith.constant 0 : index
    %5 = arith.index_cast %4 : i32 to index
    %c0_1 = arith.constant 0 : index
    %6 = vector.load %arg2[%c0, %5, %c0_1] : memref<1x8x32xbf16, #tpu.memory_space<vmem>>, vector<1x8x32xbf16>
    %7 = vector.shape_cast %6 : vector<1x8x32xbf16> to vector<8x32xbf16>
    %c0_2 = arith.constant 0 : index
    %c0_3 = arith.constant 0 : index
    %c0_4 = arith.constant 0 : index
    %8 = vector.load %arg3[%c0_2, %c0_3, %c0_4] : memref<1x8x32xf32, #tpu.memory_space<vmem>>, vector<1x8x32xf32>
    %9 = vector.shape_cast %8 : vector<1x8x32xf32> to vector<8x32xf32>
    %c0_5 = arith.constant 0 : index
    %c0_6 = arith.constant 0 : index
    %10 = vector.load %arg4[%c0_5, %c0_6] : memref<32x32xbf16, #tpu.memory_space<vmem>>, vector<32x32xbf16>
    %cst = arith.constant dense<0.000000e+00> : vector<8x32xf32>
    %11 = tpu.matmul %7, %10, %cst {dimension_numbers = #tpu.dot_dimension_numbers<[1], [0], [0], [1], [0, 0, 1, 1], [], []>} : vector<8x32xbf16>, vector<32x32xbf16>, vector<8x32xf32> -> vector<8x32xf32>
    %12 = arith.truncf %11 : vector<8x32xf32> to vector<8x32xbf16>
    %13 = vector.extract_strided_slice %12 {offsets = [0, 0], sizes = [8, 8], strides = [1, 1]} : vector<8x32xbf16> to vector<8x8xbf16>
    %c0_7 = arith.constant 0 : index
    %c0_8 = arith.constant 0 : index
    %c0_9 = arith.constant 0 : index
    %14 = vector.load %arg19[%c0_7, %c0_8, %c0_9] : memref<4x8x8xbf16, #tpu.memory_space<vmem>>, vector<1x8x8xbf16>
    %15 = vector.shape_cast %14 : vector<1x8x8xbf16> to vector<8x8xbf16>
    %16 = vector.shape_cast %13 : vector<8x8xbf16> to vector<1x8x8xbf16>
    tpu.vector_store %arg19[%c0_7, %c0_8, %c0_9], %16 {strides = array<i32>} : memref<4x8x8xbf16, #tpu.memory_space<vmem>>, vector<1x8x8xbf16>,
    %17 = vector.extract_strided_slice %12 {offsets = [0, 8], sizes = [8, 8], strides = [1, 1]} : vector<8x32xbf16> to vector<8x8xbf16>
    %c1 = arith.constant 1 : index
    %c0_10 = arith.constant 0 : index
    %c0_11 = arith.constant 0 : index
    %18 = vector.load %arg19[%c1, %c0_10, %c0_11] : memref<4x8x8xbf16, #tpu.memory_space<vmem>>, vector<1x8x8xbf16>
    %19 = vector.shape_cast %18 : vector<1x8x8xbf16> to vector<8x8xbf16>
    %20 = vector.shape_cast %17 : vector<8x8xbf16> to vector<1x8x8xbf16>
    tpu.vector_store %arg19[%c1, %c0_10, %c0_11], %20 {strides = array<i32>} : memref<4x8x8xbf16, #tpu.memory_space<vmem>>, vector<1x8x8xbf16>,
    %21 = vector.extract_strided_slice %12 {offsets = [0, 16], sizes = [8, 8], strides = [1, 1]} : vector<8x32xbf16> to vector<8x8xbf16>
    %c2 = arith.constant 2 : index
    %c0_12 = arith.constant 0 : index
    %c0_13 = arith.constant 0 : index
    %22 = vector.load %arg19[%c2, %c0_12, %c0_13] : memref<4x8x8xbf16, #tpu.memory_space<vmem>>, vector<1x8x8xbf16>
    %23 = vector.shape_cast %22 : vector<1x8x8xbf16> to vector<8x8xbf16>
    %24 = vector.shape_cast %21 : vector<8x8xbf16> to vector<1x8x8xbf16>
    tpu.vector_store %arg19[%c2, %c0_12, %c0_13], %24 {strides = array<i32>} : memref<4x8x8xbf16, #tpu.memory_space<vmem>>, vector<1x8x8xbf16>,
    %25 = vector.extract_strided_slice %12 {offsets = [0, 24], sizes = [8, 8], strides = [1, 1]} : vector<8x32xbf16> to vector<8x8xbf16>
    %c3 = arith.constant 3 : index
    %c0_14 = arith.constant 0 : index
    %c0_15 = arith.constant 0 : index
    %26 = vector.load %arg19[%c3, %c0_14, %c0_15] : memref<4x8x8xbf16, #tpu.memory_space<vmem>>, vector<1x8x8xbf16>
    %27 = vector.shape_cast %26 : vector<1x8x8xbf16> to vector<8x8xbf16>
    %28 = vector.shape_cast %25 : vector<8x8xbf16> to vector<1x8x8xbf16>
    tpu.vector_store %arg19[%c3, %c0_14, %c0_15], %28 {strides = array<i32>} : memref<4x8x8xbf16, #tpu.memory_space<vmem>>, vector<1x8x8xbf16>,
    %c0_16 = arith.constant 0 : index
    %c0_17 = arith.constant 0 : index
    %c0_18 = arith.constant 0 : index
    %29 = vector.load %arg19[%c0_16, %c0_17, %c0_18] : memref<4x8x8xbf16, #tpu.memory_space<vmem>>, vector<4x8x8xbf16>
    %c0_19 = arith.constant 0 : index
    %c0_20 = arith.constant 0 : index
    %c0_21 = arith.constant 0 : index
    %30 = vector.load %arg17[%c0_19, %c0_20, %c0_21] : memref<4x8x8xbf16, #tpu.memory_space<vmem>>, vector<4x8x8xbf16>
    %c0_22 = arith.constant 0 : index
    %c0_23 = arith.constant 0 : index
    %c0_24 = arith.constant 0 : index
    %31 = vector.load %arg18[%c0_22, %c0_23, %c0_24] : memref<4x8x8xbf16, #tpu.memory_space<vmem>>, vector<4x8x8xbf16>
    "tpu.trace_start"() <{level = 10 : i32, message = "hqd,hkd->hqk"}> : () -> ()
    %cst_25 = arith.constant dense<0.000000e+00> : vector<4x8x8xf32>
    %32 = tpu.matmul %29, %30, %cst_25 {dimension_numbers = #tpu.dot_dimension_numbers<[2], [2], [1], [1], [0, 0, 0, 1, 1, 1], [0], [0]>} : vector<4x8x8xbf16>, vector<4x8x8xbf16>, vector<4x8x8xf32> -> vector<4x8x8xf32>
    "tpu.trace_stop"() : () -> ()
    %cst_26 = arith.constant dense<0xFF800000> : vector<4x8xf32>
    %33 = vector.multi_reduction <maximumf>, %32, %cst_26 [2] : vector<4x8x8xf32> to vector<4x8xf32>
    %34 = vector.shape_cast %33 : vector<4x8xf32> to vector<4x8x1xf32>
    %35 = vector.broadcast %34 : vector<4x8x1xf32> to vector<4x8x8xf32>
    %36 = arith.subf %32, %35 : vector<4x8x8xf32>
    %37 = math.exp %36 : vector<4x8x8xf32>
    %cst_27 = arith.constant dense<0.000000e+00> : vector<4x8xf32>
    %38 = vector.multi_reduction <add>, %37, %cst_27 [2] : vector<4x8x8xf32> to vector<4x8xf32>
    %39 = vector.shape_cast %38 : vector<4x8xf32> to vector<4x8x1xf32>
    %40 = tpu.reciprocal %39 {approx = true} : vector<4x8x1xf32> -> vector<4x8x1xf32>
    %41 = vector.broadcast %40 : vector<4x8x1xf32> to vector<4x8x8xf32>
    %42 = arith.mulf %37, %41 : vector<4x8x8xf32>
    %43 = arith.truncf %42 : vector<4x8x8xf32> to vector<4x8x8xbf16>
    %c0_28 = arith.constant 0 : index
    %c0_29 = arith.constant 0 : index
    %c0_30 = arith.constant 0 : index
    %c0_31 = arith.constant 0 : index
    %44 = vector.load %arg16[%c0_28, %c0_29, %c0_30, %c0_31] : memref<1x4x8x8xbf16, #tpu.memory_space<vmem>>, vector<1x4x8x8xbf16>
    %45 = vector.shape_cast %44 : vector<1x4x8x8xbf16> to vector<4x8x8xbf16>
    %46 = vector.shape_cast %43 : vector<4x8x8xbf16> to vector<1x4x8x8xbf16>
    tpu.vector_store %arg16[%c0_28, %c0_29, %c0_30, %c0_31], %46 {strides = array<i32>} : memref<1x4x8x8xbf16, #tpu.memory_space<vmem>>, vector<1x4x8x8xbf16>,
    "tpu.trace_start"() <{level = 10 : i32, message = "hqk,hkd->hqd"}> : () -> ()
    %cst_32 = arith.constant dense<0.000000e+00> : vector<4x8x8xf32>
    %47 = tpu.matmul %43, %31, %cst_32 {dimension_numbers = #tpu.dot_dimension_numbers<[2], [1], [1], [2], [0, 0, 0, 1, 1, 2], [0], [0]>} : vector<4x8x8xbf16>, vector<4x8x8xbf16>, vector<4x8x8xf32> -> vector<4x8x8xf32>
    "tpu.trace_stop"() : () -> ()
    %48 = vector.extract_strided_slice %47 {offsets = [0, 0, 0], sizes = [1, 8, 8], strides = [1, 1, 1]} : vector<4x8x8xf32> to vector<1x8x8xf32>
    %49 = vector.shape_cast %48 : vector<1x8x8xf32> to vector<8x8xf32>
    %50 = arith.truncf %49 : vector<8x8xf32> to vector<8x8xbf16>
    %c0_33 = arith.constant 0 : index
    %c0_34 = arith.constant 0 : index
    %51 = vector.load %arg20[%c0_33, %c0_34] : memref<8x32xbf16, #tpu.memory_space<vmem>>, vector<8x8xbf16>
    tpu.vector_store %arg20[%c0_33, %c0_34], %50 {strides = array<i32>} : memref<8x32xbf16, #tpu.memory_space<vmem>>, vector<8x8xbf16>,
    %52 = vector.extract_strided_slice %47 {offsets = [1, 0, 0], sizes = [1, 8, 8], strides = [1, 1, 1]} : vector<4x8x8xf32> to vector<1x8x8xf32>
    %53 = vector.shape_cast %52 : vector<1x8x8xf32> to vector<8x8xf32>
    %54 = arith.truncf %53 : vector<8x8xf32> to vector<8x8xbf16>
    %c0_35 = arith.constant 0 : index
    %c8 = arith.constant 8 : index
    %55 = vector.load %arg20[%c0_35, %c8] : memref<8x32xbf16, #tpu.memory_space<vmem>>, vector<8x8xbf16>
    tpu.vector_store %arg20[%c0_35, %c8], %54 {strides = array<i32>} : memref<8x32xbf16, #tpu.memory_space<vmem>>, vector<8x8xbf16>,
    %56 = vector.extract_strided_slice %47 {offsets = [2, 0, 0], sizes = [1, 8, 8], strides = [1, 1, 1]} : vector<4x8x8xf32> to vector<1x8x8xf32>
    %57 = vector.shape_cast %56 : vector<1x8x8xf32> to vector<8x8xf32>
    %58 = arith.truncf %57 : vector<8x8xf32> to vector<8x8xbf16>
    %c0_36 = arith.constant 0 : index
    %c16 = arith.constant 16 : index
    %59 = vector.load %arg20[%c0_36, %c16] : memref<8x32xbf16, #tpu.memory_space<vmem>>, vector<8x8xbf16>
    tpu.vector_store %arg20[%c0_36, %c16], %58 {strides = array<i32>} : memref<8x32xbf16, #tpu.memory_space<vmem>>, vector<8x8xbf16>,
    %60 = vector.extract_strided_slice %47 {offsets = [3, 0, 0], sizes = [1, 8, 8], strides = [1, 1, 1]} : vector<4x8x8xf32> to vector<1x8x8xf32>
    %61 = vector.shape_cast %60 : vector<1x8x8xf32> to vector<8x8xf32>
    %62 = arith.truncf %61 : vector<8x8xf32> to vector<8x8xbf16>
    %c0_37 = arith.constant 0 : index
    %c24 = arith.constant 24 : index
    %63 = vector.load %arg20[%c0_37, %c24] : memref<8x32xbf16, #tpu.memory_space<vmem>>, vector<8x8xbf16>
    tpu.vector_store %arg20[%c0_37, %c24], %62 {strides = array<i32>} : memref<8x32xbf16, #tpu.memory_space<vmem>>, vector<8x8xbf16>,
    %c0_38 = arith.constant 0 : index
    %c0_39 = arith.constant 0 : index
    %64 = vector.load %arg20[%c0_38, %c0_39] : memref<8x32xbf16, #tpu.memory_space<vmem>>, vector<8x32xbf16>
    %c0_40 = arith.constant 0 : index
    %c0_41 = arith.constant 0 : index
    %65 = vector.load %arg6[%c0_40, %c0_41] : memref<32x32xbf16, #tpu.memory_space<vmem>>, vector<32x32xbf16>
    %cst_42 = arith.constant dense<0.000000e+00> : vector<8x32xf32>
    %66 = tpu.matmul %64, %65, %cst_42 {dimension_numbers = #tpu.dot_dimension_numbers<[1], [0], [0], [1], [0, 0, 1, 1], [], []>} : vector<8x32xbf16>, vector<32x32xbf16>, vector<8x32xf32> -> vector<8x32xf32>
    %67 = arith.addf %66, %9 : vector<8x32xf32>
    %cst_43 = arith.constant dense<0.000000e+00> : vector<8xf32>
    %68 = vector.multi_reduction <add>, %67, %cst_43 [1] : vector<8x32xf32> to vector<8xf32>
    %69 = vector.shape_cast %68 : vector<8xf32> to vector<8x1xf32>
    %cst_44 = arith.constant 3.200000e+01 : f32
    %70 = vector.broadcast %cst_44 : f32 to vector<8x1xf32>
    %71 = arith.divf %69, %70 : vector<8x1xf32>
    %72 = vector.broadcast %71 : vector<8x1xf32> to vector<8x32xf32>
    %73 = arith.subf %67, %72 : vector<8x32xf32>
    %74 = arith.mulf %73, %73 : vector<8x32xf32>
    %cst_45 = arith.constant dense<0.000000e+00> : vector<8xf32>
    %75 = vector.multi_reduction <add>, %74, %cst_45 [1] : vector<8x32xf32> to vector<8xf32>
    %76 = vector.shape_cast %75 : vector<8xf32> to vector<8x1xf32>
    %cst_46 = arith.constant 3.200000e+01 : f32
    %77 = vector.broadcast %cst_46 : f32 to vector<8x1xf32>
    %78 = arith.divf %76, %77 : vector<8x1xf32>
    %79 = vector.broadcast %71 : vector<8x1xf32> to vector<8x32xf32>
    %80 = arith.subf %67, %79 : vector<8x32xf32>
    %cst_47 = arith.constant 9.99999997E-7 : f32
    %81 = vector.broadcast %cst_47 : f32 to vector<8x1xf32>
    %82 = arith.addf %78, %81 : vector<8x1xf32>
    %83 = math.rsqrt %82 : vector<8x1xf32>
    %84 = vector.broadcast %83 : vector<8x1xf32> to vector<8x32xf32>
    %85 = arith.mulf %80, %84 : vector<8x32xf32>
    %c0_48 = arith.constant 0 : index
    %c0_49 = arith.constant 0 : index
    %86 = vector.load %arg7[%c0_48, %c0_49] : memref<1x32xf32, #tpu.memory_space<vmem>>, vector<1x32xf32>
    %87 = vector.broadcast %86 : vector<1x32xf32> to vector<8x32xf32>
    %88 = arith.mulf %85, %87 : vector<8x32xf32>
    %c0_50 = arith.constant 0 : index
    %c0_51 = arith.constant 0 : index
    %89 = vector.load %arg8[%c0_50, %c0_51] : memref<1x32xf32, #tpu.memory_space<vmem>>, vector<1x32xf32>
    %90 = vector.broadcast %89 : vector<1x32xf32> to vector<8x32xf32>
    %91 = arith.addf %88, %90 : vector<8x32xf32>
    %92 = arith.truncf %91 : vector<8x32xf32> to vector<8x32xbf16>
    %c0_52 = arith.constant 0 : index
    %c0_53 = arith.constant 0 : index
    %93 = vector.load %arg9[%c0_52, %c0_53] : memref<32x64xbf16, #tpu.memory_space<vmem>>, vector<32x64xbf16>
    %cst_54 = arith.constant dense<0.000000e+00> : vector<8x64xf32>
    %94 = tpu.matmul %92, %93, %cst_54 {dimension_numbers = #tpu.dot_dimension_numbers<[1], [0], [0], [1], [0, 0, 1, 1], [], []>} : vector<8x32xbf16>, vector<32x64xbf16>, vector<8x64xf32> -> vector<8x64xf32>
    %c0_55 = arith.constant 0 : index
    %c0_56 = arith.constant 0 : index
    %95 = vector.load %arg10[%c0_55, %c0_56] : memref<1x64xf32, #tpu.memory_space<vmem>>, vector<1x64xf32>
    %96 = vector.broadcast %95 : vector<1x64xf32> to vector<8x64xf32>
    %97 = arith.addf %94, %96 : vector<8x64xf32>
    %cst_57 = arith.constant 0.000000e+00 : f32
    %98 = vector.broadcast %cst_57 : f32 to vector<8x64xf32>
    %99 = arith.maximumf %97, %98 : vector<8x64xf32>
    %100 = arith.truncf %99 : vector<8x64xf32> to vector<8x64xbf16>
    %c0_58 = arith.constant 0 : index
    %c0_59 = arith.constant 0 : index
    %101 = vector.load %arg11[%c0_58, %c0_59] : memref<64x32xbf16, #tpu.memory_space<vmem>>, vector<64x32xbf16>
    %cst_60 = arith.constant dense<0.000000e+00> : vector<8x32xf32>
    %102 = tpu.matmul %100, %101, %cst_60 {dimension_numbers = #tpu.dot_dimension_numbers<[1], [0], [0], [1], [0, 0, 1, 1], [], []>} : vector<8x64xbf16>, vector<64x32xbf16>, vector<8x32xf32> -> vector<8x32xf32>
    %c0_61 = arith.constant 0 : index
    %c0_62 = arith.constant 0 : index
    %103 = vector.load %arg12[%c0_61, %c0_62] : memref<1x32xf32, #tpu.memory_space<vmem>>, vector<1x32xf32>
    %104 = vector.broadcast %103 : vector<1x32xf32> to vector<8x32xf32>
    %105 = arith.addf %102, %104 : vector<8x32xf32>
    %106 = arith.addf %105, %91 : vector<8x32xf32>
    %cst_63 = arith.constant dense<0.000000e+00> : vector<8xf32>
    %107 = vector.multi_reduction <add>, %106, %cst_63 [1] : vector<8x32xf32> to vector<8xf32>
    %108 = vector.shape_cast %107 : vector<8xf32> to vector<8x1xf32>
    %cst_64 = arith.constant 3.200000e+01 : f32
    %109 = vector.broadcast %cst_64 : f32 to vector<8x1xf32>
    %110 = arith.divf %108, %109 : vector<8x1xf32>
    %111 = vector.broadcast %110 : vector<8x1xf32> to vector<8x32xf32>
    %112 = arith.subf %106, %111 : vector<8x32xf32>
    %113 = arith.mulf %112, %112 : vector<8x32xf32>
    %cst_65 = arith.constant dense<0.000000e+00> : vector<8xf32>
    %114 = vector.multi_reduction <add>, %113, %cst_65 [1] : vector<8x32xf32> to vector<8xf32>
    %115 = vector.shape_cast %114 : vector<8xf32> to vector<8x1xf32>
    %cst_66 = arith.constant 3.200000e+01 : f32
    %116 = vector.broadcast %cst_66 : f32 to vector<8x1xf32>
    %117 = arith.divf %115, %116 : vector<8x1xf32>
    %118 = vector.broadcast %110 : vector<8x1xf32> to vector<8x32xf32>
    %119 = arith.subf %106, %118 : vector<8x32xf32>
    %cst_67 = arith.constant 9.99999997E-7 : f32
    %120 = vector.broadcast %cst_67 : f32 to vector<8x1xf32>
    %121 = arith.addf %117, %120 : vector<8x1xf32>
    %122 = math.rsqrt %121 : vector<8x1xf32>
    %123 = vector.broadcast %122 : vector<8x1xf32> to vector<8x32xf32>
    %124 = arith.mulf %119, %123 : vector<8x32xf32>
    %c0_68 = arith.constant 0 : index
    %c0_69 = arith.constant 0 : index
    %125 = vector.load %arg13[%c0_68, %c0_69] : memref<1x32xf32, #tpu.memory_space<vmem>>, vector<1x32xf32>
    %126 = vector.broadcast %125 : vector<1x32xf32> to vector<8x32xf32>
    %127 = arith.mulf %124, %126 : vector<8x32xf32>
    %c0_70 = arith.constant 0 : index
    %c0_71 = arith.constant 0 : index
    %128 = vector.load %arg14[%c0_70, %c0_71] : memref<1x32xf32, #tpu.memory_space<vmem>>, vector<1x32xf32>
    %129 = vector.broadcast %128 : vector<1x32xf32> to vector<8x32xf32>
    %130 = arith.addf %127, %129 : vector<8x32xf32>
    %c0_72 = arith.constant 0 : index
    %c0_73 = arith.constant 0 : index
    %c0_74 = arith.constant 0 : index
    %131 = vector.load %arg15[%c0_72, %c0_73, %c0_74] : memref<1x8x32xf32, #tpu.memory_space<vmem>>, vector<1x8x32xf32>
    %132 = vector.shape_cast %131 : vector<1x8x32xf32> to vector<8x32xf32>
    %133 = vector.shape_cast %130 : vector<8x32xf32> to vector<1x8x32xf32>
    tpu.vector_store %arg15[%c0_72, %c0_73, %c0_74], %133 {strides = array<i32>} : memref<1x8x32xf32, #tpu.memory_space<vmem>>, vector<1x8x32xf32>,
    return
  }
  func.func @transform_0(%arg0: i32, %arg1: i32) -> (i32, i32, i32) {
    %c0_i32 = arith.constant 0 : i32
    %c0_i32_0 = arith.constant 0 : i32
    %c0_i32_1 = arith.constant 0 : i32
    return %arg0, %c0_i32, %c0_i32_0 : i32, i32, i32
  }
  func.func @transform_1(%arg0: i32, %arg1: i32) -> (i32, i32, i32) {
    %c0_i32 = arith.constant 0 : i32
    %c0_i32_0 = arith.constant 0 : i32
    return %arg0, %arg1, %c0_i32 : i32, i32, i32
  }
  func.func @transform_2(%arg0: i32, %arg1: i32) -> (i32, i32) {
    %c0_i32 = arith.constant 0 : i32
    %c0_i32_0 = arith.constant 0 : i32
    %c0_i32_1 = arith.constant 0 : i32
    return %c0_i32, %c0_i32_0 : i32, i32
  }
  func.func @transform_3(%arg0: i32, %arg1: i32) -> (i32, i32) {
    %c0_i32 = arith.constant 0 : i32
    %c0_i32_0 = arith.constant 0 : i32
    %c0_i32_1 = arith.constant 0 : i32
    return %c0_i32, %c0_i32_0 : i32, i32
  }
  func.func @transform_4(%arg0: i32, %arg1: i32) -> (i32, i32) {
    %c0_i32 = arith.constant 0 : i32
    %c0_i32_0 = arith.constant 0 : i32
    %c0_i32_1 = arith.constant 0 : i32
    return %c0_i32, %c0_i32_0 : i32, i32
  }
  func.func @transform_5(%arg0: i32, %arg1: i32) -> (i32, i32) {
    %c0_i32 = arith.constant 0 : i32
    %c0_i32_0 = arith.constant 0 : i32
    %c0_i32_1 = arith.constant 0 : i32
    return %c0_i32, %c0_i32_0 : i32, i32
  }
  func.func @transform_6(%arg0: i32, %arg1: i32) -> (i32, i32) {
    %c0_i32 = arith.constant 0 : i32
    %c0_i32_0 = arith.constant 0 : i32
    %c0_i32_1 = arith.constant 0 : i32
    return %c0_i32, %c0_i32_0 : i32, i32
  }
  func.func @transform_7(%arg0: i32, %arg1: i32) -> (i32, i32) {
    %c0_i32 = arith.constant 0 : i32
    %c0_i32_0 = arith.constant 0 : i32
    %c0_i32_1 = arith.constant 0 : i32
    return %c0_i32, %c0_i32_0 : i32, i32
  }
  func.func @transform_8(%arg0: i32, %arg1: i32) -> (i32, i32) {
    %c0_i32 = arith.constant 0 : i32
    %c0_i32_0 = arith.constant 0 : i32
    %c0_i32_1 = arith.constant 0 : i32
    return %c0_i32, %c0_i32_0 : i32, i32
  }
  func.func @transform_9(%arg0: i32, %arg1: i32) -> (i32, i32) {
    %c0_i32 = arith.constant 0 : i32
    %c0_i32_0 = arith.constant 0 : i32
    %c0_i32_1 = arith.constant 0 : i32
    return %c0_i32, %c0_i32_0 : i32, i32
  }
  func.func @transform_10(%arg0: i32, %arg1: i32) -> (i32, i32) {
    %c0_i32 = arith.constant 0 : i32
    %c0_i32_0 = arith.constant 0 : i32
    %c0_i32_1 = arith.constant 0 : i32
    return %c0_i32, %c0_i32_0 : i32, i32
  }
  func.func @transform_11(%arg0: i32, %arg1: i32) -> (i32, i32) {
    %c0_i32 = arith.constant 0 : i32
    %c0_i32_0 = arith.constant 0 : i32
    %c0_i32_1 = arith.constant 0 : i32
    return %c0_i32, %c0_i32_0 : i32, i32
  }
  func.func @transform_12(%arg0: i32, %arg1: i32) -> (i32, i32) {
    %c0_i32 = arith.constant 0 : i32
    %c0_i32_0 = arith.constant 0 : i32
    %c0_i32_1 = arith.constant 0 : i32
    return %c0_i32, %c0_i32_0 : i32, i32
  }
  func.func @transform_13(%arg0: i32, %arg1: i32) -> (i32, i32, i32) {
    %c0_i32 = arith.constant 0 : i32
    %c0_i32_0 = arith.constant 0 : i32
    return %arg0, %arg1, %c0_i32 : i32, i32, i32
  }
  func.func @transform_14(%arg0: i32, %arg1: i32) -> (i32, i32, i32, i32) {
    %c0_i32 = arith.constant 0 : i32
    %c0_i32_0 = arith.constant 0 : i32
    %c0_i32_1 = arith.constant 0 : i32
    return %arg0, %c0_i32, %arg1, %c0_i32_0 : i32, i32, i32, i32
  }
}

</mosaic_0001>

<bundles_post_ra>
// kernel: tpu_custom_call.1
= control target key start
LH: loop header
LB: loop body
LE: loop exit
PB: predicated region body
PF: predicated region fallthrough
CT: control target
= control target key end

     0   :  { %s2148_s0 = inlined_call_operand.hbm [shape: bf16[2,8,32], index: 0, kind: input, shape index: {}]   ;;  %s2149_s1 = inlined_call_operand.vmem [shape: f32[2,8,32], index: 1, kind: input, shape index: {}]   ;;  %s2150_s2 = inlined_call_operand.vmem [shape: bf16[32,32], index: 2, kind: input, shape index: {}]   ;;  %s2151_s3 = inlined_call_operand.vmem [shape: bf16[32,64], index: 3, kind: input, shape index: {}]   ;;  %s2152_s4 = inlined_call_operand.hbm [shape: bf16[32,32], index: 4, kind: input, shape index: {}]   ;;  %s2153_s5 = inlined_call_operand.vmem [shape: f32[1,32], index: 5, kind: input, shape index: {}]   ;;  %s2154_s6 = inlined_call_operand.vmem [shape: f32[1,32], index: 6, kind: input, shape index: {}]   ;;  %s2155_s7 = inlined_call_operand.hbm [shape: bf16[32,64], index: 7, kind: input, shape index: {}]   ;;  %s2156_s8 = inlined_call_operand.vmem [shape: f32[1,64], index: 8, kind: input, shape index: {}]   ;;  %s2157_s9 = inlined_call_operand.vmem [shape: bf16[64,32], index: 9, kind: input, shape index: {}]   ;;  %s2158_s10 = inlined_call_operand.vmem [shape: f32[1,32], index: 10, kind: input, shape index: {}]   ;;  %s2159_s11 = inlined_call_operand.vmem [shape: f32[1,32], index: 11, kind: input, shape index: {}]   ;;  %s2160_s12 = inlined_call_operand.vmem [shape: f32[1,32], index: 12, kind: input, shape index: {}]   ;;  %s2161_s13 = inlined_call_operand.hbm [shape: f32[2,8,32], index: 13, kind: output, shape index: {0}]   ;;  %s2162_s14 = inlined_call_operand.hbm [shape: bf16[2,4,8,8], index: 14, kind: output, shape index: {1}]  }
   0x1   :  { %2169 = sst [smem:[#allocation22_spill]] %s2148_s0 }
   0x2   :  { %2170 = sst [smem:[#allocation23_spill]] %s2149_s1 }
   0x3   :  { %2171 = sst [smem:[#allocation24_spill]] %s2150_s2 }
   0x4   :  { %2172 = sst [smem:[#allocation25_spill]] %s2152_s4 }
   0x5   :  { %2173 = sst [smem:[#allocation26_spill]] %s2155_s7 }
   0x6   :  { %2174 = sst [smem:[#allocation27_spill]] %s2159_s11 }
   0x7   :  { %2175 = sst [smem:[#allocation28_spill]] %s2160_s12 }
   0x8   :  { %2176 = sst [smem:[#allocation29_spill]] %s2161_s13 }
   0x9   :  { %2177 = sst [smem:[#allocation30_spill]] %s2162_s14 }
   0xa   :  { %20 = vsyncpa [#allocation7], 0 }
   0xb   :  { %22 = vsyncpa [#allocation7 + $0x1], 0 }
   0xc   :  { %23 = vsyncpa [#allocation10], 0 }
   0xd   :  { %24 = vsyncpa [#allocation8], 0 }
   0xe   :  { %26 = vsyncpa [#allocation8 + $0x1], 0 }
   0xf   :  { %27 = vsyncpa [#allocation14], 0 }
  0x10   :  { %29 = vsyncpa [#allocation14 + $0x1], 0  ;;  %s1867_s29 = smov 0   ;;  %s1869_s30 = smov 0  }
  0x11   :  { %s1871_s15 = smov 0   ;;  %s1873_s16 = smov 0  }
  0x12   :  { %s1875_s17 = smov 0   ;;  %s1877_s18 = smov 0  }
  0x13 LB: > { %2178 = sst [smem:[#allocation19_spill]] %s1753_s29  ;;  %s2163_s19 = sadd.s32 4294967295, %s1773_s18   ;;  %s1773_s18 = sphi %s1877_s18, %s35_s18   ;;  %s1769_s17 = sphi %s1875_s17, %s2199_s17   ;;  %s1765_s16 = sphi %s1873_s16, %s2198_s16   ;;  %s1761_s15 = sphi %s1871_s15, %s2202_s15   ;;  %s1757_s30 = sphi %s1869_s30, %s2201_s30   ;;  %s1753_s29 = sphi %s1867_s29, %s2200_s29  }
  0x14   : > { %2179 = sst [smem:[#allocation20_spill]] %s1769_s17  ;;  %p1340_p0 = scmp.ge.s32.totalorder %s1773_s18, 1 }
  0x15   : > { %p1901_p1 = scmp.eq.s32.totalorder %s2163_s19, 0  ;;  %p393_p2 = scmp.lt.s32.totalorder %s1773_s18, 3 }
  0x16   : > { %s2181_s4 = sld [smem:[#allocation25_spill]]  ;;  %s1775_s25 = smov [#allocation9]  }
  0x17   : > { %p1909_p3 = pnand %p1340_p0, %p393_p2  ;;  %s412_s26 = sshll.u32 %s1775_s25, 4  ;;  %s413_s26 = int_to_ptr.vmem [resolvable:$true] %s412_s26 }
  0x18   : > { %p1343_p6 = scmp.ge.s32.totalorder %s1773_s18, 2  ;;  %s2183_s7 = sld [smem:[#allocation26_spill]] }
  0x19   : > { %p1448_p4 = pneg %p1909_p3  ;;  %s1776_s22 = smov 64  }
  0x1a   : > { %s1777_s19 = smov 4   ;;  %s1778_s25 = smov [#allocation11]  }
  0x1b   : > { %p1449_p5 = pnand %p1448_p4, %p1901_p1  ;;  %s47_s12 = sadd.s32 1, %s1769_s17 }
  0x1c   : > { %s410_s23 = sshll.u32 %s2181_s4, 4  ;;  %s432_s4 = sshll.u32 %s1778_s25, 4  ;;  %s411_s23 = int_to_ptr.hbm [resolvable:$true] %s410_s23  ;;  %s433_s4 = int_to_ptr.vmem [resolvable:$true] %s432_s4 }
  0x1d   : > { %1451 = dma.hbm_to_vmem [thread:$0]  (!%p1449_p5), %s411_s23, 256, %s413_s26, [#allocation10], %s1776_s22, %s1776_s22, %s1777_s19  }
  0x1e   : > { %s430_s21 = sshll.u32 %s2183_s7, 4  ;;  %s1339_s13 = sadd.s32 4294967294, %s1773_s18   ;;  %s431_s21 = int_to_ptr.hbm [resolvable:$true] %s430_s21 }
  0x1f   : > { %1454 = dma.hbm_to_vmem [thread:$0]  (!%p1449_p5), %s431_s21, 256, %s433_s4, [#allocation10], %s1776_s22, %s1776_s22, %s1777_s19  }
  0x20   : > { %p49_p7 = scmp.ge.s32.totalorder %s47_s12, 2  ;;  %s54_s27 = sadd.s32 1, %s1761_s15 }
  0x21   : > { %p61_p8 = scmp.ne.s32.totalorder %s1761_s15, %s1757_s30  ;;  %p62_p9 = scmp.eq.s32.totalorder %s1773_s18, 0 }
  0x22   : > { %s2204_s12 = smov (%p49_p7, %s47_s12), 0  ;;  %p67_p10 = scmp.ne.s32.totalorder %s1757_s30, %s1753_s29 }
  0x23   : > { %2184 = sst [smem:[#allocation21_spill]] %s2204_s12  ;;  %s51_s23 = ssub.s32 %s1769_s17, %s2204_s12 }
  0x24   : > { %s2185_s26 = sadd.s32 4294967295, %s1773_s18   ;;  %p52_p12 = scmp.eq.s32.totalorder %s51_s23, 0 }
  0x25   : > { %p352_p11 = scmp.eq.s32.totalorder %s2185_s26, 1  ;;  %p1937_p13 = por %p1901_p1, %p67_p10 }
  0x26   : > { %p358_p2 = scmp.eq.s32.totalorder %s1339_s13, 1  ;;  %p63_p4 = por %p62_p9, %p61_p8 }
  0x27   : > { %p1941_p0 = por %p352_p11, %p61_p8  ;;  %s461_s22 = sand.u32 1, %s1761_s15  }
  0x28   : > { %s1946_s28 = scalar_select %p52_p12, %s1761_s15, %s54_s27  }
  0x29   : > { %p1948_p5 = por %p358_p2, %p67_p10  ;;  %s1345_s25 = sshll.u32 %s1769_s17, 2 }
  0x2a   : > { %p1468_p7 = scmp.lt.s32.totalorder %s1773_s18, 2  ;;  %s1344_s23 = sshll.u32 %s461_s22, 2 }
  0x2b   : > { %s2189_s0 = sld [smem:[#allocation22_spill]]  ;;  %s465_s11 = scalar_lea.vmem [#allocation6], %s1344_s23 }
  0x2c   : > { %s473_s14 = sshll.u32 %s465_s11, 4  ;;  %p1456_p11 = pnand %p1468_p7, %p63_p4  ;;  %s474_s14 = int_to_ptr.vmem [resolvable:$true] %s473_s14 }
  0x2d   : > { %s462_s13 = scalar_lea.sflag [#allocation7], %s461_s22  ;;  %s1961_s27 = sand.u32 (!%p1909_p3), 1, %s1757_s30  }
  0x2e   : > { %s1347_s17 = sshll.u32 (!%p1909_p3), %s1961_s27, 2  ;;  %s495_s7 = scalar_lea.sflag (!%p1909_p3), [#allocation7], %s1961_s27 }
  0x2f   : > { %492 = sbr.rel (%p1909_p3) target bundleno = 1931 (0x78b), region = 72 }
  0x31   : > { %s469_s12 = scalar_lea.hbm %s2189_s0, %s1345_s25  ;;  %s498_s25 = scalar_lea.vmem (!%p1909_p3), [#allocation6], %s1347_s17 }
  0x32   : > { %s471_s29 = sshll.u32 %s469_s12, 4  ;;  %s472_s29 = int_to_ptr.hbm [resolvable:$true] %s471_s29 }
  0x33   : > { %1458 = dma.hbm_to_vmem [thread:$0]  (!%p1456_p11), %s472_s29, 64, %s474_s14, %s462_s13  }
  0x34   : > { %1736 = dma.done.wait (%p1937_p13), %s495_s7, 64  }
  0x35   : > { %1738 = vsyncadd (%p1937_p13), %s495_s7, 4294967232 }
  0x36   : > { %1740 = dma.done.wait (%p1901_p1), [#allocation10], 512  }
  0x37   : > { %1742 = vsyncadd (%p1901_p1), [#allocation10], 4294966784  ;;  %v1422_v0 = vld [vmem:[%s2151_s3 + $0x8] sm:$0xff]  ;;  %s2190_s2 = sld [smem:[#allocation24_spill]]  ;;  %v1421_v2 = vld [vmem:[%s2151_s3] sm:$0xff]  ;;  %vm595_vm0 = vcmask 261120  }
  0x38   : > { %605 = vmatpush.bf16.msra.mxu0 %v1422_v0  ;;  %v578_v4 = vld [vmem:[%s498_s25] sm:$0xf]  ;;  %vm613_vm1 = vcmask 60416   ;;  %s1779_s20 = smov 112   ;;  %s1780_s23 = smov 120   ;;  %vm721_vm2 = vcmask 64512  }
  0x39   : > { %v655_v5 = vld [vmem:[%s498_s25] sm:$0xf]  ;;  %s1781_s26 = smov 104   ;;  %s1782_s13 = smov 88   ;;  %vm853_vm3 = vcmask 1043456   ;;  %vm934_vm4 = vcmask 126016  }
  0x3a   : > { %s1783_s7 = smov 80   ;;  %s1784_s25 = smov 96   ;;  %vm941_vm5 = vcmask 191616   ;;  %vm948_vm6 = vcmask 257216   ;;  %vm1097_vm11 = vcmask 523264  }
  0x3b   : > { %s1785_s11 = smov 72   ;;  %s1351_s12 = sshll.u32 %s1961_s27, 4 }
  0x3c   : > { %606 = vmatpush.bf16.msra.mxu0 %v1421_v2  ;;  %s2028_s14 = scalar_lea.vmem [#allocation13], %s1351_s12  ;;  %s1786_s29 = smov 16  }
  0x3d   : > { %v1424_v1 = vld [vmem:[%s2190_s2 + $0x8] sm:$0xff]  ;;  %v1423_v3 = vld [vmem:[%s2190_s2] sm:$0xff]  ;;  %s1787_s17 = smov 8   ;;  %s1788_s24 = smov 24  }
  0x3e   : > { %683 = vmatpush.bf16.msra.mxu1 %v1424_v1  ;;  %p566_p1 = scmp.lt.s32.totalorder %s1765_s16, 1  ;;  %s2191_s1 = sld [smem:[#allocation23_spill]] }
  0x3f   : > { %1361 = vmatmul.msk.bf16.vlgmr.msra.gmra.mxu0 %vm595_vm0, %v578_v4 }
  0x40   : > { %s567_s4 = scalar_select %p566_p1, %s1765_s16, 1 }
  0x42   : > { %684 = vmatpush.bf16.msra.mxu1 %v1423_v3  ;;  %s1352_s22 = sshll.u32 %s567_s4, 3 }
  0x45   : > { %1370 = vmatmul.msk.bf16.vlgmr.msra.gmra.mxu1 %vm595_vm0, %v655_v5 }
  0xbc   : > { %v608_v6 = vpop.f32.mrf.mxu0 }
  0xbd   : > { %v1987_v8 = vpack.c.bf16 %v608_v6, %v608_v6 }
  0xbf   : > { %614 = vst.msk [vmem:[#allocation2] sm:$0xf] %vm613_vm1, %v1987_v8  ;;  %630 = vrot.lane.b32.xlu1 %v1987_v8, %s1779_s20  ;;  %620 = vrot.lane.b32.xlu0 %v1987_v8, %s1780_s23 }
  0xc2   : > { %v686_v7 = vpop.f32.mrf.mxu1 }
  0xc3   : > { %v690_v9 = vpack.c.bf16 %v686_v7, %v686_v7 }
  0xc4   : > { %v610_v10 = vpop.f32.mrf.mxu0 }
  0xc5   : > { %692 = vst.msk [vmem:[#allocation4] sm:$0xf] %vm613_vm1, %v690_v9  ;;  %699 = vrot.lane.b32.xlu2 %v690_v9, %s1779_s20 }
  0xc6   : > { %v713_v12 = vld [vmem:[#allocation2] sm:$0xf] }
  0xc7   : > { %640 = vrot.lane.b32.xlu1 %v1987_v8, %s1781_s26  ;;  %694 = vrot.lane.b32.xlu0 %v690_v9, %s1780_s23  ;;  %v726_v13 = vsel %vm721_vm2, %v713_v12, 0  ;;  %s1154_s23 = scalar_lea.sflag [#allocation14], %s1961_s27 }
  0xc8   : > { %735 = vmatpush.bf16.xpose.msra.mxu2 %v726_v13 }
  0xca   : > { %v688_v11 = vpop.f32.mrf.mxu1 }
  0xcc   : > { %v709_v14 = vld [vmem:[#allocation4] sm:$0xf] }
  0xcd   : > { %704 = vrot.lane.b32.xlu2 %v690_v9, %s1781_s26  ;;  %s572_s26 = scalar_lea.vmem %s2191_s1, %s1352_s22  ;;  %s1182_s22 = sshll.u32 %s2028_s14, 4  ;;  %s1183_s22 = int_to_ptr.vmem [resolvable:$true] %s1182_s22 }
  0xcf   : > { %1371 = vmatmul.msk.bf16.vlgmr.msra.gmra.mxu2 %vm721_vm2, %v709_v14 }
 0x11f   : > { %v700_v15 = vpop.permute.xlu2 %699 }
 0x120   : > { %703 = vst.msk [vmem:[#allocation4 + $0x8] sm:$0xf] %vm613_vm1, %v700_v15 }
 0x127   : > { %v705_v16 = vpop.permute.xlu2 %704  ;;  %v711_v25 = vld [vmem:[#allocation4 + $0x8] sm:$0xf] }
 0x128   : > { %708 = vst.msk [vmem:[#allocation4 + $0xc] sm:$0xf] %vm613_vm1, %v705_v16 }
 0x12f   : > { %v712_v29 = vld [vmem:[#allocation4 + $0xc] sm:$0xf] }
 0x131   : > { %v631_v17 = vpop.permute.xlu1 %630  ;;  %v621_v18 = vpop.permute.xlu0 %620 }
 0x132   : > { %634 = vst.msk [vmem:[#allocation2 + $0x8] sm:$0xf] %vm613_vm1, %v631_v17 }
 0x133   : > { %624 = vst.msk [vmem:[#allocation2 + $0x4] sm:$0xf] %vm613_vm1, %v621_v18 }
 0x139   : > { %v641_v19 = vpop.permute.xlu1 %640  ;;  %v695_v20 = vpop.permute.xlu0 %694  ;;  %v715_v21 = vld [vmem:[#allocation2 + $0x8] sm:$0xf] }
 0x13a   : > { %644 = vst.msk [vmem:[#allocation2 + $0xc] sm:$0xf] %vm613_vm1, %v641_v19  ;;  %v714_v22 = vld [vmem:[#allocation2 + $0x4] sm:$0xf]  ;;  %v764_v23 = vsel %vm721_vm2, %v715_v21, 0 }
 0x13b   : > { %698 = vst.msk [vmem:[#allocation4 + $0x4] sm:$0xf] %vm613_vm1, %v695_v20  ;;  %v745_v24 = vsel %vm721_vm2, %v714_v22, 0  ;;  %773 = vmatpush.bf16.xpose.msrb.mxu0 %v764_v23 }
 0x13c   : > { %754 = vmatpush.bf16.xpose.msra.mxu3 %v745_v24 }
 0x141   : > { %v716_v26 = vld [vmem:[#allocation2 + $0xc] sm:$0xf] }
 0x142   : > { %v710_v27 = vld [vmem:[#allocation4 + $0x4] sm:$0xf]  ;;  %1373 = vmatmul.msk.bf16.vlgmr.msrb.gmra.mxu0 %vm721_vm2, %v711_v25  ;;  %v783_v28 = vsel %vm721_vm2, %v716_v26, 0 }
 0x143   : > { %1372 = vmatmul.msk.bf16.vlgmr.msra.gmra.mxu3 %vm721_vm2, %v710_v27  ;;  %792 = vmatpush.bf16.xpose.msrb.mxu1 %v783_v28 }
 0x14a   : > { %1374 = vmatmul.msk.bf16.vlgmr.msrb.gmra.mxu1 %vm721_vm2, %v712_v29 }
 0x152   : > { %v737_v30 = vpop.f32.mrf.mxu2 }
 0x153   : > { %v798_v41 = vsel %vm721_vm2, %v737_v30, -inf }
 0x15a   : > { %v739_v31 = vpop.f32.mrf.mxu2 }
 0x1bf   : > { %v775_v32 = vpop.f32.mrf.mxu0 }
 0x1c0   : > { %v804_v33 = vsel %vm721_vm2, %v775_v32, -inf }
 0x1c1   : > { %805 = vmax.xlane.f32.xlu1 %v804_v33 }
 0x1c6   : > { %v756_v34 = vpop.f32.mrf.mxu3 }
 0x1c7   : > { %v794_v35 = vpop.f32.mrf.mxu1  ;;  %v801_v36 = vsel %vm721_vm2, %v756_v34, -inf  ;;  %v777_v37 = vpop.f32.mrf.mxu0 }
 0x1c8   : > { %802 = vmax.xlane.f32.xlu0 %v801_v36  ;;  %v807_v38 = vsel %vm721_vm2, %v794_v35, -inf }
 0x1c9   : > { %808 = vmax.xlane.f32.xlu2 %v807_v38  ;;  %v1426_v38 = vld [vmem:[#allocation9 + $0x8] sm:$0xff] }
 0x1ce   : > { %v758_v39 = vpop.f32.mrf.mxu3 }
 0x1cf   : > { %v796_v40 = vpop.f32.mrf.mxu1  ;;  %v1425_v39 = vld [vmem:[#allocation9] sm:$0xff] }
 0x1d1   : > { %799 = vmax.xlane.f32.xlu2 %v798_v41 }
 0x1dc   : > { %625 = vrot.lane.b32.xlu0 %v1987_v8, %s1782_s13 }
 0x1e9   : > { %635 = vrot.lane.b32.xlu2 %v1987_v8, %s1783_s7 }
 0x1f1   : > { %616 = vrot.lane.b32.xlu2 %v1987_v8, %s1784_s25 }
 0x234   : > { %v806_v42 = vpop.xlane.xlu1 %805 }
 0x235   : > { %v812_v43 = vsub.f32 %v775_v32, %v806_v42 }
 0x237   : > { %v818_v44 = vmul.f32 1.442695, %v812_v43 }
 0x239   : > { %1543 = vpow2.f32 %v818_v44  ;;  %v656_v44 = vld [vmem:[%s572_s26] sm:$0xff] }
 0x23b   : > { %v803_v45 = vpop.xlane.xlu0 %802 }
 0x23c   : > { %v811_v46 = vsub.f32 %v756_v34, %v803_v45  ;;  %v809_v47 = vpop.xlane.xlu2 %808 }
 0x23d   : > { %v813_v48 = vsub.f32 %v794_v35, %v809_v47 }
 0x23e   : > { %v816_v49 = vmul.f32 1.442695, %v811_v46 }
 0x23f   : > { %v1544_v50 = vpop.eup %1543  ;;  %v820_v51 = vmul.f32 1.442695, %v813_v48 }
 0x240   : > { %1545 = vpow2.f32 %v816_v49  ;;  %v828_v52 = vsel %vm721_vm2, %v1544_v50, 0.0  ;;  %v1789_v49 = vmov 32.0  }
 0x241   : > { %1547 = vpow2.f32 %v820_v51  ;;  %829 = vadd.xlane.f32.xlu1 %v828_v52 }
 0x244   : > { %v800_v53 = vpop.xlane.xlu2 %799 }
 0x245   : > { %v810_v54 = vsub.f32 %v737_v30, %v800_v53 }
 0x246   : > { %v1546_v55 = vpop.eup %1545 }
 0x247   : > { %v1548_v56 = vpop.eup %1547  ;;  %v814_v57 = vmul.f32 1.442695, %v810_v54  ;;  %v825_v59 = vsel %vm721_vm2, %v1546_v55, 0.0 }
 0x248   : > { %v831_v58 = vsel %vm721_vm2, %v1548_v56, 0.0 }
 0x249   : > { %1549 = vpow2.f32 %v814_v57  ;;  %832 = vadd.xlane.f32.xlu0 %v831_v58  ;;  %826 = vadd.xlane.f32.xlu1 %v825_v59 }
 0x24c   : > { %v636_v60 = vpop.permute.xlu2 %635 }
 0x24d   : > { %639 = vst.msk [vmem:[#allocation3 + $0x8] sm:$0xf] %vm613_vm1, %v636_v60 }
 0x24e   : > { %v626_v61 = vpop.permute.xlu0 %625 }
 0x24f   : > { %v1550_v62 = vpop.eup %1549  ;;  %629 = vst.msk [vmem:[#allocation3 + $0x4] sm:$0xf] %vm613_vm1, %v626_v61  ;;  %v1428_v61 = vld [vmem:[#allocation11 + $0x8] sm:$0xff] }
 0x250   : > { %v822_v63 = vsel %vm721_vm2, %v1550_v62, 0.0 }
 0x251   : > { %823 = vadd.xlane.f32.xlu2 %v822_v63  ;;  %v1432_v63 = vld [vmem:[%s2157_s9 + $0x18] sm:$0xff] }
 0x254   : > { %v617_v0 = vpop.permute.xlu2 %616  ;;  %v719_v1 = vld [vmem:[#allocation3 + $0x8] sm:$0xf] }
 0x255   : > { %619 = vst.msk [vmem:[#allocation3] sm:$0xf] %vm613_vm1, %v617_v0  ;;  %v893_v2 = vsel %vm853_vm3, %v719_v1, 0 }
 0x256   : > { %902 = vmatpush.bf16.msra.mxu0 %v893_v2  ;;  %v718_v3 = vld [vmem:[#allocation3 + $0x4] sm:$0xf] }
 0x257   : > { %v874_v4 = vsel %vm853_vm3, %v718_v3, 0  ;;  %v1431_v2 = vld [vmem:[%s2157_s9 + $0x10] sm:$0xff] }
 0x258   : > { %883 = vmatpush.bf16.msrb.mxu3 %v874_v4 }
 0x25a   : > { %1105 = vmatpush.bf16.msrb.mxu0 %v1432_v63 }
 0x25c   : > { %v717_v5 = vld [vmem:[#allocation3] sm:$0xf]  ;;  %1052 = vmatpush.bf16.msra.mxu3 %v1428_v61 }
 0x25d   : > { %v855_v6 = vsel %vm853_vm3, %v717_v5, 0 }
 0x25e   : > { %864 = vmatpush.bf16.msrb.mxu2 %v855_v6  ;;  %1106 = vmatpush.bf16.msrb.mxu0 %v1431_v2 }
 0x262   : > { %645 = vrot.lane.b32.xlu1 %v1987_v8, %s1785_s11  ;;  %976 = vmatpush.bf16.msra.mxu2 %v1426_v38  ;;  %s1433_s11 = sshll.u32 %s1765_s16, 4 }
 0x266   : > { %977 = vmatpush.bf16.msra.mxu2 %v1425_v39 }
 0x2b4   : > { %v830_v7 = vpop.xlane.xlu1 %829 }
 0x2b5   : > { %1551 = vrcp.f32 %v830_v7 }
 0x2bb   : > { %v1552_v9 = vpop.eup %1551 }
 0x2bc   : > { %v840_v10 = vmul.f32 %v1552_v9, %v1544_v50  ;;  %v833_v11 = vpop.xlane.xlu0 %832  ;;  %v827_v12 = vpop.xlane.xlu1 %826 }
 0x2bd   : > { %1553 = vrcp.f32 %v833_v11  ;;  %v1537_v11 = vld [vmem:[%s2153_s5] ss:$0 sm:$0xff] }
 0x2be   : > { %v844_v13 = vpack.c.bf16 %v840_v10, %v840_v10  ;;  %1555 = vrcp.f32 %v827_v12 }
 0x2c0   : > { %848 = vst.msk [vmem:[%s2028_s14 + $0x8] sm:$0xf] %vm613_vm1, %v844_v13  ;;  %1377 = vmatmul.msk.bf16.vlgmr.msra.gmra.mxu0 %vm721_vm2, %v844_v13  ;;  %v1538_v13 = vld [vmem:[%s2154_s6] ss:$0 sm:$0xff] }
 0x2c3   : > { %v1554_v8 = vpop.eup %1553 }
 0x2c4   : > { %v1556_v14 = vpop.eup %1555  ;;  %v841_v15 = vmul.f32 %v1554_v8, %v1548_v56  ;;  %v824_v16 = vpop.xlane.xlu2 %823 }
 0x2c5   : > { %v839_v17 = vmul.f32 %v1556_v14, %v1546_v55  ;;  %1557 = vrcp.f32 %v824_v16 }
 0x2c6   : > { %v845_v18 = vpack.c.bf16 %v841_v15, %v841_v15  ;;  %1559 = vrcp.f32 %v1789_v49 }
 0x2c7   : > { %v843_v19 = vpack.c.bf16 %v839_v17, %v839_v17  ;;  %v1430_v17 = vld [vmem:[%s2157_s9 + $0x8] sm:$0xff] }
 0x2c8   : > { %849 = vst.msk [vmem:[%s2028_s14 + $0xc] sm:$0xf] %vm613_vm1, %v845_v18  ;;  %1107 = vmatpush.bf16.msrb.mxu0 %v1430_v17 }
 0x2c9   : > { %847 = vst.msk [vmem:[%s2028_s14 + $0x4] sm:$0xf] %vm613_vm1, %v843_v19  ;;  %1376 = vmatmul.msk.bf16.vlgmr.msrb.gmra.mxu3 %vm721_vm2, %v843_v19  ;;  %v1539_v19 = vld [vmem:[%s2156_s8] ss:$0 sm:$0xff] }
 0x2cb   : > { %v1558_v20 = vpop.eup %1557 }
 0x2cc   : > { %v838_v21 = vmul.f32 %v1558_v20, %v1550_v62  ;;  %v1560_v50 = vpop.eup %1559  ;;  %v1427_v62 = vld [vmem:[#allocation11] sm:$0xff] }
 0x2cd   : > { %v987_v51 = vmul.f32 32.0, %v1560_v50  ;;  %vm991_vm7 = vweird.f32 %v1560_v50  ;;  %1053 = vmatpush.bf16.msra.mxu3 %v1427_v62 }
 0x2ce   : > { %v842_v22 = vpack.c.bf16 %v838_v21, %v838_v21 }
 0x2cf   : > { %v988_v52 = vsub.f32 1.0, %v987_v51 }
 0x2d0   : > { %846 = vst.msk [vmem:[%s2028_s14] sm:$0xf] %vm613_vm1, %v842_v22  ;;  %1375 = vmatmul.msk.bf16.vlgmr.msrb.gmra.mxu2 %vm721_vm2, %v842_v22 }
 0x2d1   : > { %v989_v53 = vmul.f32 %v1560_v50, %v988_v52 }
 0x2d3   : > { %v990_v54 = vadd.f32 %v1560_v50, %v989_v53 }
 0x2d4   : > { %v646_v23 = vpop.permute.xlu1 %645 }
 0x2d5   : > { %649 = vst.msk [vmem:[#allocation3 + $0xc] sm:$0xf] %vm613_vm1, %v646_v23  ;;  %v2052_v55 = vsel %vm991_vm7, %v1560_v50, %v990_v54 }
 0x2dc   : > { %v720_v24 = vld [vmem:[#allocation3 + $0xc] sm:$0xf] }
 0x2dd   : > { %v912_v25 = vsel %vm853_vm3, %v720_v24, 0 }
 0x2de   : > { %921 = vmatpush.bf16.msra.mxu1 %v912_v25  ;;  %v1540_v25 = vld [vmem:[%s2158_s10] ss:$0 sm:$0xff] }
 0x2e1   : > { %1378 = vmatmul.msk.bf16.vlgmr.msra.gmra.mxu1 %vm721_vm2, %v845_v18  ;;  %v1429_v18 = vld [vmem:[%s2157_s9] sm:$0xff] }
 0x2e2   : > { %1108 = vmatpush.bf16.msrb.mxu0 %v1429_v18 }
 0x33d   : > { %v904_v26 = vpop.f32.mrf.mxu0 }
 0x33e   : > { %v936_v27 = vpack.c.bf16 %v904_v26, %v904_v26 }
 0x340   : > { %938 = vrot.lane.b32.xlu1 %v936_v27, %s1786_s29 }
 0x345   : > { %v906_v28 = vpop.f32.mrf.mxu0 }
 0x34c   : > { %v885_v29 = vpop.f32.mrf.mxu3 }
 0x34d   : > { %v929_v30 = vpack.c.bf16 %v885_v29, %v885_v29 }
 0x34f   : > { %931 = vrot.lane.b32.xlu1 %v929_v30, %s1787_s17  ;;  %s2192_s17 = sld [smem:[#allocation30_spill]] }
 0x353   : > { %v866_v31 = vpop.f32.mrf.mxu2 }
 0x354   : > { %v927_v32 = vpack.c.bf16 %v866_v31, %v866_v31  ;;  %v887_v33 = vpop.f32.mrf.mxu3 }
 0x355   : > { %s1181_s4 = scalar_lea.hbm %s2192_s17, %s1433_s11 }
 0x356   : > { %928 = vst.msk [vmem:[#allocation5] sm:$0xf] %vm613_vm1, %v927_v32  ;;  %s1184_s20 = sshll.u32 %s1181_s4, 4  ;;  %s1185_s20 = int_to_ptr.hbm [resolvable:$true] %s1184_s20 }
 0x357   : > { %s1669_s26 = sshra.s32 %s1185_s20, 4  ;;  %s1670_s26 = int_to_ptr.hbm [resolvable:$true] %s1669_s26 }
 0x358   : > { %s1671_s13 = scalar_lea.hbm %s1670_s26, 16 }
 0x359   : > { %p1672_p3 = scmp.ne.s32.totalorder %s1670_s26, %s1671_s13 }
 0x35b   : > { %v868_v34 = vpop.f32.mrf.mxu2  ;;  %p1673_p8 = pnand %p1672_p3, %p1941_p0 }
 0x35d   : > { %p1674_p9 = pneg %p1673_p8 }
 0x35e   : > { %v923_v35 = vpop.f32.mrf.mxu1 }
 0x35f   : > { %v943_v36 = vpack.c.bf16 %v923_v35, %v923_v35 }
 0x361   : > { %945 = vrot.lane.b32.xlu1 %v943_v36, %s1788_s24  ;;  %s2193_s24 = smov %s2192_s17 }
 0x362   : > { %s1675_s0 = scalar_lea.hbm %s2193_s24, 32  ;;  %p1676_p10 = scmp.lt.s32.totalorder %s1670_s26, %s2193_s24 }
 0x363   : > { %p1677_p12 = scmp.lt.s32.totalorder %s1675_s0, %s1671_s13 }
 0x365   : > { %p1678_p13 = por %p1677_p12, %p1676_p10 }
 0x366   : > { %v925_v37 = vpop.f32.mrf.mxu1 }
 0x367   : > { %p1679_p2 = pnand %p1678_p13, %p1674_p9 }
 0x3b2   : > { %v939_v40 = vpop.permute.xlu1 %938 }
 0x3c1   : > { %v932_v41 = vpop.permute.xlu1 %931 }
 0x3c2   : > { %935 = vst.msk [vmem:[#allocation5] sm:$0xf] %vm934_vm4, %v932_v41 }
 0x3c3   : > { %942 = vst.msk [vmem:[#allocation5] sm:$0xf] %vm941_vm5, %v939_v40 }
 0x3d3   : > { %v946_v42 = vpop.permute.xlu1 %945 }
 0x3d4   : > { %949 = vst.msk [vmem:[#allocation5] sm:$0xf] %vm948_vm6, %v946_v42 }
 0x3db   : > { %v950_v43 = vld [vmem:[#allocation5] sm:$0xf] }
 0x3dc   : > { %1387 = vmatmul.msk.bf16.vlgmr.msra.gmra.mxu2 %vm595_vm0, %v950_v43 }
 0x45f   : > { %v979_v45 = vpop.f32.mrf.mxu2 }
 0x460   : > { %v980_v46 = vadd.f32 %v979_v45, %v656_v44 }
 0x462   : > { %v983_v47 = vsel %vm595_vm0, %v980_v46, 0.0 }
 0x463   : > { %984 = vadd.xlane.f32.xlu0 %v983_v47 }
 0x467   : > { %v981_v48 = vpop.f32.mrf.mxu2 }
 0x4d6   : > { %v985_v56 = vpop.xlane.xlu0 %984 }
 0x4d7   : > { %v993_v57 = vmul.f32 %v2052_v55, %v985_v56 }
 0x4d9   : > { %v994_v58 = vsub.f32 %v980_v46, %v993_v57 }
 0x4db   : > { %v995_v59 = vmul.f32 %v994_v58, %v994_v58 }
 0x4dd   : > { %v996_v60 = vsel %vm595_vm0, %v995_v59, 0.0 }
 0x4de   : > { %997 = vadd.xlane.f32.xlu1 %v996_v60 }
 0x551   : > { %v998_v0 = vpop.xlane.xlu1 %997 }
 0x552   : > { %v999_v1 = vmul.f32 %v998_v0, %v2052_v55 }
 0x554   : > { %v1000_v3 = vadd.f32 1e-06, %v999_v1 }
 0x556   : > { %1561 = vrsqrt.f32 %v1000_v3  ;;  %vm1007_vm9 = vweird.f32 %v1000_v3 }
 0x55c   : > { %v1562_v4 = vpop.eup %1561 }
 0x55d   : > { %v1002_v5 = vmul.f32 %v1562_v4, %v1000_v3  ;;  %vm1008_vm8 = vweird.f32 %v1562_v4 }
 0x55e   : > { %vm1009_vm10 = vmor %vm1007_vm9, %vm1008_vm8 }
 0x55f   : > { %v1003_v6 = vmul.f32 %v1562_v4, %v1002_v5 }
 0x561   : > { %v1004_v7 = vmul.f32 0.5, %v1003_v6 }
 0x563   : > { %v1005_v9 = vsub.f32 1.5, %v1004_v7 }
 0x565   : > { %v1006_v10 = vmul.f32 %v1562_v4, %v1005_v9 }
 0x567   : > { %v1010_v12 = vsel %vm1009_vm10, %v1562_v4, %v1006_v10 }
 0x568   : > { %v1011_v8 = vmul.f32 %v1010_v12, %v994_v58 }
 0x56a   : > { %v1016_v14 = vmul.f32 %v1537_v11, %v1011_v8 }
 0x56c   : > { %v1021_v15 = vadd.f32 %v1538_v13, %v1016_v14 }
 0x56e   : > { %v1022_v16 = vpack.c.bf16 %v1021_v15, %v1021_v15 }
 0x570   : > { %1396 = vmatmul.msk.bf16.vlgmr.msra.gmra.mxu3 %vm595_vm0, %v1022_v16 }
 0x5f3   : > { %v1055_v20 = vpop.f32.mrf.mxu3 }
 0x5f4   : > { %v1056_v21 = vadd.f32 %v1539_v19, %v1055_v20 }
 0x5f6   : > { %v1059_v22 = vmax.f32 %v1056_v21, 0.0 }
 0x5f8   : > { %v1060_v23 = vpack.c.bf16 %v1059_v22, %v1059_v22 }
 0x5fa   : > { %1413 = vmatmul.msk.bf16.vlgmr.msrb.gmra.mxu0 %vm1097_vm11, %v1060_v23 }
 0x5fb   : > { %v1057_v24 = vpop.f32.mrf.mxu3 }
 0x677   : > { %v1110_v26 = vpop.f32.mrf.mxu0 }
 0x678   : > { %v1111_v27 = vadd.f32 %v1540_v25, %v1110_v26 }
 0x67a   : > { %v1114_v28 = vadd.f32 %v1111_v27, %v1021_v15 }
 0x67c   : > { %v1115_v29 = vsel %vm595_vm0, %v1114_v28, 0.0 }
 0x67d   : > { %1116 = vadd.xlane.f32.xlu0 %v1115_v29 }
 0x67f   : > { %v1112_v30 = vpop.f32.mrf.mxu0 }
 0x6f0   : > { %v1117_v31 = vpop.xlane.xlu0 %1116 }
 0x6f1   : > { %v1118_v32 = vmul.f32 %v1117_v31, %v2052_v55 }
 0x6f3   : > { %v1119_v33 = vsub.f32 %v1114_v28, %v1118_v32 }
 0x6f5   : > { %v1120_v34 = vmul.f32 %v1119_v33, %v1119_v33 }
 0x6f7   : > { %v1121_v35 = vsel %vm595_vm0, %v1120_v34, 0.0 }
 0x6f8   : > { %1122 = vadd.xlane.f32.xlu0 %v1121_v35 }
 0x6f9   : > { %1682 = shalt.err (!%p1679_p2)
}
 0x6fa   : > { %s1790_s14 = smov 64   ;;  %s1791_s11 = smov 4  }
 0x6fb   : > { %1445 = dma.vmem_to_hbm [thread:$0]  (%p1941_p0), %s1183_s22, 256, %s1185_s20, %s1154_s23, %s1790_s14, %s1790_s14, %s1791_s11  }
 0x6fc   : > { %s1350_s0 = sshll.u32 %s1961_s27, 3  ;;  %s1416_s1 = sshll.u32 %s1765_s16, 3 }
 0x6fd   : > { %s2194_s29 = sld [smem:[#allocation27_spill]]  ;;  %s558_s16 = scalar_lea.vmem [#allocation12], %s1350_s0 }
 0x6fe   : > { %s2195_s22 = sld [smem:[#allocation29_spill]]  ;;  %s1167_s7 = sshll.u32 %s558_s16, 4  ;;  %s1168_s7 = int_to_ptr.vmem [resolvable:$true] %s1167_s7 }
 0x6ff   : > { %s2196_s13 = sld [smem:[#allocation28_spill]]  ;;  %s1149_s14 = scalar_lea.sflag [#allocation8], %s1961_s27 }
 0x703   : > { %v1541_v45 = vld [vmem:[%s2194_s29] ss:$0 sm:$0xff] }
 0x704   : > { %s1165_s20 = scalar_lea.hbm %s2195_s22, %s1416_s1  ;;  %s1703_s0 = scalar_lea.hbm %s2195_s22, 16 }
 0x705   : > { %v1542_v48 = vld [vmem:[%s2196_s13] ss:$0 sm:$0xff]  ;;  %s1169_s25 = sshll.u32 %s1165_s20, 4  ;;  %s1170_s25 = int_to_ptr.hbm [resolvable:$true] %s1169_s25 }
 0x706   : > { %s1697_s11 = sshra.s32 %s1170_s25, 4  ;;  %s1698_s11 = int_to_ptr.hbm [resolvable:$true] %s1697_s11 }
 0x707   : > { %s1699_s1 = scalar_lea.hbm %s1698_s11, 8  ;;  %p1704_p1 = scmp.lt.s32.totalorder %s1698_s11, %s2195_s22 }
 0x708   : > { %p1700_p4 = scmp.ne.s32.totalorder %s1698_s11, %s1699_s1  ;;  %p1705_p3 = scmp.lt.s32.totalorder %s1703_s0, %s1699_s1 }
 0x70a   : > { %p1701_p7 = pnand %p1700_p4, %p1941_p0  ;;  %p1706_p8 = por %p1705_p3, %p1704_p1 }
 0x70c   : > { %p1702_p11 = pneg %p1701_p7 }
 0x70e   : > { %p1707_p9 = pnand %p1706_p8, %p1702_p11 }
 0x76b   : > { %v1123_v36 = vpop.xlane.xlu0 %1122 }
 0x76c   : > { %v1124_v37 = vmul.f32 %v1123_v36, %v2052_v55 }
 0x76e   : > { %v1125_v38 = vadd.f32 1e-06, %v1124_v37 }
 0x770   : > { %1563 = vrsqrt.f32 %v1125_v38  ;;  %vm1132_vm13 = vweird.f32 %v1125_v38 }
 0x776   : > { %v1564_v39 = vpop.eup %1563 }
 0x777   : > { %v1127_v40 = vmul.f32 %v1564_v39, %v1125_v38  ;;  %vm1133_vm12 = vweird.f32 %v1564_v39 }
 0x778   : > { %vm1134_vm14 = vmor %vm1132_vm13, %vm1133_vm12 }
 0x779   : > { %v1128_v41 = vmul.f32 %v1564_v39, %v1127_v40 }
 0x77b   : > { %v1129_v42 = vmul.f32 0.5, %v1128_v41 }
 0x77d   : > { %v1130_v43 = vsub.f32 1.5, %v1129_v42 }
 0x77f   : > { %v1131_v44 = vmul.f32 %v1564_v39, %v1130_v43 }
 0x781   : > { %v1135_v46 = vsel %vm1134_vm14, %v1564_v39, %v1131_v44 }
 0x782   : > { %v1136_v47 = vmul.f32 %v1135_v46, %v1119_v33 }
 0x784   : > { %v1141_v49 = vmul.f32 %v1541_v45, %v1136_v47 }
 0x786   : > { %v1146_v50 = vadd.f32 %v1542_v48, %v1141_v49 }
 0x788   : > { %1147 = vst.msk [vmem:[%s558_s16] sm:$0xff] %vm595_vm0, %v1146_v50 }
 0x789   : > { %1710 = shalt.err (!%p1707_p9)
}
 0x78a   : > { %1444 = dma.vmem_to_hbm [thread:$0]  (%p1941_p0), %s1168_s7, 128, %s1170_s25, %s1149_s14  }
 0x78b PF: > { %s2197_s27 = sld [smem:[#allocation19_spill]]  ;;  %p1460_p10 = pnand %p1343_p6, %p1948_p5 }
 0x78d   : > { %p1461_p12 = pneg %p1460_p10 }
 0x791   : > { %s1199_s4 = sand.u32 1, %s2197_s27  }
 0x792   : > { %s1200_s20 = scalar_lea.sflag [#allocation8], %s1199_s4 }
 0x793   : > { %1744 = dma.done.wait (%p1461_p12), %s1200_s20, 128  }
 0x794   : > { %1746 = vsyncadd (%p1461_p12), %s1200_s20, 4294967168  ;;  %s1210_s23 = scalar_lea.sflag [#allocation14], %s1199_s4 }
 0x795   : > { %1748 = dma.done.wait (%p1461_p12), %s1210_s23, 256  }
 0x796   : > { %1750 = vsyncadd (%p1461_p12), %s1210_s23, 4294967040  ;;  %s35_s18 = sadd.s32 1, %s1773_s18   ;;  %s2198_s16 = sld [smem:[#allocation20_spill]] }
 0x797   : > { %p32_p13 = scmp.ge.s32.totalorder %s35_s18, 4   ;;  %s2199_s17 = sld [smem:[#allocation21_spill]] }
 0x798   : > { %s2200_s29 = smov %s1757_s30  ;;  %s2201_s30 = smov %s1761_s15 }
 0x799   : > { %s2202_s15 = smov %s1946_s28  ;;  %34 = sbr.rel (!%p32_p13) target bundleno = 19 (0x13), region = 159 }
 0x79e   :  { %1216 = vsyncpa [#allocation7], 1 }
 0x79f   :  { %1218 = vsyncpa [#allocation7 + $0x1], 1 }
 0x7a0   :  { %1219 = vsyncpa [#allocation10], 1 }
 0x7a1   :  { %1220 = vsyncpa [#allocation8], 1 }
 0x7a2   :  { %1222 = vsyncpa [#allocation8 + $0x1], 1 }
 0x7a3   :  { %1223 = vsyncpa [#allocation14], 1 }
 0x7a4   :  { %1225 = vsyncpa [#allocation14 + $0x1], 1 }

</bundles_post_ra>
